<compile_context>
chip_gen: v5e
topology: v5e:2x2
jax: 0.10.0
libtpu: 0.0.40
codegen_flags: <defaults>
</compile_context>

<pallas_src>
import jax
import jax.numpy as jnp
from jax import lax
from jax.experimental import pallas as pl
from jax.experimental.pallas import tpu as pltpu

LANE = 128          # TPU lane width; hidden dim padded to this
SUBLANE = 8
NEG_INF = -1e30     # masks padded output rows before softmax (unused when
                    # output_size is already a multiple of 8)


def _round_up(n, m):
    return ((n + m - 1) // m) * m


# ---------------------------------------------------------------------------
# Parameter init (mimics nn.Linear default U[-1/sqrt(fan_in), +]) and packing.
# ---------------------------------------------------------------------------
def init_policy_net_params(key, input_size, size_hidden, output_size):
    ks = jax.random.split(key, 6)

    def lin(kw, kb, fan_in, fan_out):
        bound = 1.0 / jnp.sqrt(float(fan_in))
        # stored as [in, out] so the kernel computes x @ W
        w = jax.random.uniform(kw, (fan_in, fan_out), jnp.float32, -bound, bound)
        b = jax.random.uniform(kb, (1, fan_out), jnp.float32, -bound, bound)
        return w, b

    w1, b1 = lin(ks[0], ks[1], input_size, size_hidden)
    w2, b2 = lin(ks[2], ks[3], size_hidden, size_hidden)
    wo, bo = lin(ks[4], ks[5], size_hidden, output_size)
    return (w1, b1, w2, b2, wo, bo)


def pack_policy_params(params):
    """Pack (w1,b1,w2,b2,wo,bo) into one lane-dense (rows, 128) f32 slab.

    Row layout (all offsets are multiples of 8):
      [0,                in_p)              : w1    (in_p x 128, zero padded)
      [in_p,             in_p+128)          : w2    (128 x 128, zero padded)
      [in_p+128,         +out_p)            : Wo^T  (out_p x 128, zero padded)
      [in_p+128+out_p,   +out_p)            : bo broadcast over 128 lanes,
                                              pad rows filled with NEG_INF
      [in_p+128+2*out_p, +8)                : row0=b1, row1=b2, rest 0
    """
    w1, b1, w2, b2, wo, bo = params
    input_size, hidden = w1.shape
    output_size = wo.shape[1]
    assert hidden <= LANE, "single-tile packing assumes hidden <= 128"
    in_p = _round_up(input_size, SUBLANE)
    out_p = _round_up(output_size, SUBLANE)

    def pad2(a, rows, cols, value=0.0):
        return jnp.pad(a, ((0, rows - a.shape[0]), (0, cols - a.shape[1])),
                       constant_values=value)

    w1p = pad2(w1.astype(jnp.float32), in_p, LANE)
    w2p = pad2(w2.astype(jnp.float32), LANE, LANE)
    wotp = pad2(wo.T.astype(jnp.float32), out_p, LANE)           # (out_p, 128)

    bo_rows = jnp.broadcast_to(bo.reshape(-1, 1).astype(jnp.float32),
                               (output_size, LANE))
    bo_blk = jnp.concatenate(
        [bo_rows,
         jnp.full((out_p - output_size, LANE), NEG_INF, jnp.float32)], axis=0)

    b1p = pad2(b1.reshape(1, -1).astype(jnp.float32), 1, LANE)
    b2p = pad2(b2.reshape(1, -1).astype(jnp.float32), 1, LANE)
    b12_blk = jnp.concatenate(
        [b1p, b2p, jnp.zeros((SUBLANE - 2, LANE), jnp.float32)], axis=0)

    slab = jnp.concatenate([w1p, w2p, wotp, bo_blk, b12_blk], axis=0)
    return slab, in_p, out_p, input_size, output_size


# ---------------------------------------------------------------------------
# Kernel
# ---------------------------------------------------------------------------
def _make_policy_kernel(in_p, out_p):
    w2_off = in_p
    wo_off = in_p + LANE
    bo_off = wo_off + out_p
    b12_off = bo_off + out_p

    def kernel(x_ref, slab_ref, out_ref):
        x = x_ref[...]                                     # (tb, in_p)
        # static, 8-aligned sublane slices of the VMEM-resident parameter slab
        w1 = slab_ref[0:in_p, :]                           # (in_p, 128)
        w2 = slab_ref[w2_off:w2_off + LANE, :]             # (128, 128)
        wo_t = slab_ref[wo_off:wo_off + out_p, :]          # (out_p, 128)
        bo_col = slab_ref[bo_off:bo_off + out_p, 0:1]      # (out_p, 1)
        b12 = slab_ref[b12_off:b12_off + SUBLANE, :]       # (8, 128)
        b1 = b12[0:1, :]
        b2 = b12[1:2, :]

        # fc1 + ReLU / fc2 + ReLU  (lane-dense, f32 accumulation)
        h1 = jnp.maximum(
            jnp.dot(x, w1, preferred_element_type=jnp.float32) + b1, 0.0)
        h2 = jnp.maximum(
            jnp.dot(h1, w2, preferred_element_type=jnp.float32) + b2, 0.0)

        # Output layer computed TRANSPOSED: logits_T[o, b] = sum_k Wo^T[o,k]*h2[b,k]
        # -> batch lands on the lane axis and only out_p sublanes are stored.
        logits_t = lax.dot_general(
            wo_t, h2, (((1,), (1,)), ((), ())),
            preferred_element_type=jnp.float32) + bo_col    # (out_p, tb)

        # softmax over the output (sublane) axis; padded rows carry -1e30 -> 0
        m = jnp.max(logits_t, axis=0, keepdims=True)        # (1, tb)
        e = jnp.exp(logits_t - m)
        denom = jnp.sum(e, axis=0, keepdims=True)           # (1, tb)
        # exact normalization (previous approx reciprocal broke sum==1)
        out_ref[...] = (e / denom).astype(out_ref.dtype)

    return kernel


# ---------------------------------------------------------------------------
# Wrapper
# ---------------------------------------------------------------------------
def _choose_batch_tile(B, block_b):
    """Pick (tb, padded_B).  Guarantees >=2 grid steps when B > 128 so the
    'parallel' batch axis can split across v7x's two TensorCores, and keeps
    the output tile lane-dense (tb multiple of 128) for large batches."""
    b8 = _round_up(max(B, 1), SUBLANE)
    if b8 <= LANE:                       # tiny batch: single tile, grid=(1,)
        return b8, b8
    half = _round_up(pl.cdiv(b8, 2), LANE)        # >=2 tiles for megacore
    tb = max(LANE, min(_round_up(block_b, LANE), half))
    b_p = _round_up(B, tb)
    return tb, b_p


def policy_net_forward(x, packed, *, block_b=1024):
    slab, in_p, out_p, input_size, output_size = packed
    B = x.shape[0]
    tb, b_p = _choose_batch_tile(B, block_b)

    x_p = x.astype(jnp.float32)
    if b_p != B or in_p != input_size:
        x_p = jnp.pad(x_p, ((0, b_p - B), (0, in_p - input_size)))

    slab_rows = slab.shape[0]
    out_t = pl.pallas_call(
        _make_policy_kernel(in_p, out_p),
        out_shape=jax.ShapeDtypeStruct((out_p, b_p), jnp.float32),
        grid=(b_p // tb,),
        in_specs=[
            pl.BlockSpec((tb, in_p), lambda i: (i, 0)),          # x tile
            pl.BlockSpec((slab_rows, LANE), lambda i: (0, 0)),   # resident params
        ],
        out_specs=pl.BlockSpec((out_p, tb), lambda i: (0, i)),   # transposed out
        compiler_params=pltpu.CompilerParams(
            dimension_semantics=("parallel",)),                  # megacore split
    )(x_p, slab)

    # (out_p, b_p) -> (B, output_size): touches only the real output data.
    return out_t[:output_size, :B].T


# ---------------------------------------------------------------------------
# Pure-JAX reference
# ---------------------------------------------------------------------------
def policy_net_ref(x, params):
    w1, b1, w2, b2, wo, bo = params
    h1 = jnp.maximum(x @ w1 + b1, 0.0)
    h2 = jnp.maximum(h1 @ w2 + b2, 0.0)
    return jax.nn.softmax(h2 @ wo + bo, axis=1)


if __name__ == "__main__":
    input_size = 16
    size_hidden = 32
    output_size = 8
    batch = 8

    key = jax.random.PRNGKey(0)
    k_x, k_p = jax.random.split(key)

    x = jax.random.normal(k_x, (batch, input_size), dtype=jnp.float32)
    params = init_policy_net_params(k_p, input_size, size_hidden, output_size)
    packed = pack_policy_params(params)

    # jit the whole forward so the wrapper pad / slice / transpose fuse with
    # the pallas_call (tiny-batch case is otherwise XLA-op / launch bound).
    fwd = jax.jit(lambda xx: policy_net_forward(xx, packed))
    out = jax.block_until_ready(fwd(x))

    ref = policy_net_ref(x, params)
    assert out.shape == (batch, output_size)
    # probabilities: rows sum to 1 (exact normalization in the kernel)
    assert jnp.allclose(jnp.sum(out, axis=1), 1.0, atol=1e-4)
    assert jnp.allclose(out, ref, atol=1e-3, rtol=1e-3)

    print("KERNEL_OK")
</pallas_src>

<mosaic_0001>
module attributes {stable_mosaic.version = 11 : i64} {
  func.func @kernel(%arg0: i32, %arg1: memref<8x16xf32, #tpu.memory_space<vmem>>, %arg2: memref<168x128xf32, #tpu.memory_space<vmem>>, %arg3: memref<8x8xf32, #tpu.memory_space<vmem>>) attributes {dimension_semantics = [#tpu.dimension_semantics<parallel>], iteration_bounds = array<i64: 1>, scalar_prefetch = 0 : i64, scratch_operands = 0 : i64, tpu.core_type = #tpu.core_type<tc>, window_params = [{transform_indices = @transform_0, window_bounds = array<i64: 8, 16>}, {pipeline_mode = #tpu.pipeline_mode<synchronous>, transform_indices = @transform_1, window_bounds = array<i64: 168, 128>}, {transform_indices = @transform_2, window_bounds = array<i64: 8, 8>}]} {
    %c0 = arith.constant 0 : index
    %c0_0 = arith.constant 0 : index
    %0 = vector.load %arg1[%c0, %c0_0] : memref<8x16xf32, #tpu.memory_space<vmem>>, vector<8x16xf32>
    %c0_1 = arith.constant 0 : index
    %c0_2 = arith.constant 0 : index
    %1 = vector.load %arg2[%c0_1, %c0_2] : memref<168x128xf32, #tpu.memory_space<vmem>>, vector<16x128xf32>
    %c16 = arith.constant 16 : index
    %c0_3 = arith.constant 0 : index
    %2 = vector.load %arg2[%c16, %c0_3] : memref<168x128xf32, #tpu.memory_space<vmem>>, vector<128x128xf32>
    %c144 = arith.constant 144 : index
    %c0_4 = arith.constant 0 : index
    %3 = vector.load %arg2[%c144, %c0_4] : memref<168x128xf32, #tpu.memory_space<vmem>>, vector<8x128xf32>
    %c152 = arith.constant 152 : index
    %c0_5 = arith.constant 0 : index
    %4 = vector.load %arg2[%c152, %c0_5] : memref<168x128xf32, #tpu.memory_space<vmem>>, vector<8x1xf32>
    %c160 = arith.constant 160 : index
    %c0_6 = arith.constant 0 : index
    %5 = vector.load %arg2[%c160, %c0_6] : memref<168x128xf32, #tpu.memory_space<vmem>>, vector<8x128xf32>
    %6 = vector.extract_strided_slice %5 {offsets = [0, 0], sizes = [1, 128], strides = [1, 1]} : vector<8x128xf32> to vector<1x128xf32>
    %7 = vector.extract_strided_slice %5 {offsets = [1, 0], sizes = [1, 128], strides = [1, 1]} : vector<8x128xf32> to vector<1x128xf32>
    %cst = arith.constant dense<0.000000e+00> : vector<8x128xf32>
    %8 = tpu.matmul %0, %1, %cst {dimension_numbers = #tpu.dot_dimension_numbers<[1], [0], [0], [1], [0, 0, 1, 1], [], []>} : vector<8x16xf32>, vector<16x128xf32>, vector<8x128xf32> -> vector<8x128xf32>
    %9 = vector.broadcast %6 : vector<1x128xf32> to vector<8x128xf32>
    %10 = arith.addf %8, %9 : vector<8x128xf32>
    %cst_7 = arith.constant 0.000000e+00 : f32
    %11 = vector.broadcast %cst_7 : f32 to vector<8x128xf32>
    %12 = arith.maximumf %10, %11 : vector<8x128xf32>
    %cst_8 = arith.constant dense<0.000000e+00> : vector<8x128xf32>
    %13 = tpu.matmul %12, %2, %cst_8 {dimension_numbers = #tpu.dot_dimension_numbers<[1], [0], [0], [1], [0, 0, 1, 1], [], []>} : vector<8x128xf32>, vector<128x128xf32>, vector<8x128xf32> -> vector<8x128xf32>
    %14 = vector.broadcast %7 : vector<1x128xf32> to vector<8x128xf32>
    %15 = arith.addf %13, %14 : vector<8x128xf32>
    %cst_9 = arith.constant 0.000000e+00 : f32
    %16 = vector.broadcast %cst_9 : f32 to vector<8x128xf32>
    %17 = arith.maximumf %15, %16 : vector<8x128xf32>
    %cst_10 = arith.constant dense<0.000000e+00> : vector<8x8xf32>
    %18 = tpu.matmul %3, %17, %cst_10 {dimension_numbers = #tpu.dot_dimension_numbers<[1], [1], [0], [0], [0, 0, 1, 0], [], []>} : vector<8x128xf32>, vector<8x128xf32>, vector<8x8xf32> -> vector<8x8xf32>
    %19 = vector.broadcast %4 : vector<8x1xf32> to vector<8x8xf32>
    %20 = arith.addf %18, %19 : vector<8x8xf32>
    %cst_11 = arith.constant dense<0xFF800000> : vector<8xf32>
    %21 = vector.multi_reduction <maximumf>, %20, %cst_11 [0] : vector<8x8xf32> to vector<8xf32>
    %22 = vector.shape_cast %21 : vector<8xf32> to vector<1x8xf32>
    %23 = vector.broadcast %22 : vector<1x8xf32> to vector<8x8xf32>
    %24 = arith.subf %20, %23 : vector<8x8xf32>
    %25 = math.exp %24 : vector<8x8xf32>
    %cst_12 = arith.constant dense<0.000000e+00> : vector<8xf32>
    %26 = vector.multi_reduction <add>, %25, %cst_12 [0] : vector<8x8xf32> to vector<8xf32>
    %27 = vector.shape_cast %26 : vector<8xf32> to vector<1x8xf32>
    %28 = vector.broadcast %27 : vector<1x8xf32> to vector<8x8xf32>
    %29 = arith.divf %25, %28 : vector<8x8xf32>
    %c0_13 = arith.constant 0 : index
    %c0_14 = arith.constant 0 : index
    %30 = vector.load %arg3[%c0_13, %c0_14] : memref<8x8xf32, #tpu.memory_space<vmem>>, vector<8x8xf32>
    tpu.vector_store %arg3[%c0_13, %c0_14], %29 {strides = array<i32>} : memref<8x8xf32, #tpu.memory_space<vmem>>, vector<8x8xf32>,
    return
  }
  func.func @transform_0(%arg0: i32) -> (i32, i32) {
    %c0_i32 = arith.constant 0 : i32
    %c0_i32_0 = arith.constant 0 : i32
    return %arg0, %c0_i32 : i32, i32
  }
  func.func @transform_1(%arg0: i32) -> (i32, i32) {
    %c0_i32 = arith.constant 0 : i32
    %c0_i32_0 = arith.constant 0 : i32
    %c0_i32_1 = arith.constant 0 : i32
    return %c0_i32, %c0_i32_0 : i32, i32
  }
  func.func @transform_2(%arg0: i32) -> (i32, i32) {
    %c0_i32 = arith.constant 0 : i32
    %c0_i32_0 = arith.constant 0 : i32
    return %c0_i32, %arg0 : i32, i32
  }
}

</mosaic_0001>

<bundles_post_ra>
// kernel: _lambda_.1
= control target key start
LH: loop header
LB: loop body
LE: loop exit
PB: predicated region body
PF: predicated region fallthrough
CT: control target
= control target key end

     0   :  { %7 = vsyncpa [#allocation3], 0  ;;  %s271_s0 = inlined_call_operand.hbm [shape: f32[8,16], index: 0, kind: input, shape index: {}]   ;;  %s272_s1 = inlined_call_operand.hbm [shape: f32[168,128], index: 1, kind: input, shape index: {}]   ;;  %s273_s2 = inlined_call_operand.vmem [shape: f32[8,8], index: 2, kind: output, shape index: {}]  }
   0x1   :  { %s14_s11 = sshll.u32 %s271_s0, 4  ;;  %s15_s11 = int_to_ptr.hbm [resolvable:$true] %s14_s11 }
   0x2   :  { %8 = vsyncpa [#allocation5], 0  ;;  %s239_s12 = smov [#allocation2]   ;;  %s24_s16 = sshll.u32 %s272_s1, 4  ;;  %s25_s16 = int_to_ptr.hbm [resolvable:$true] %s24_s16 }
   0x3   :  { %s16_s13 = sshll.u32 %s239_s12, 4  ;;  %s240_s17 = smov [#allocation4]   ;;  %s17_s13 = int_to_ptr.vmem [resolvable:$true] %s16_s13 }
   0x4   :  { %19 = dma.hbm_to_vmem [thread:$0]  %s15_s11, 128, %s17_s13, [#allocation3]  }
   0x5   :  { %s26_s18 = sshll.u32 %s240_s17, 4  ;;  %s241_s19 = smov 128   ;;  %s27_s18 = int_to_ptr.vmem [resolvable:$true] %s26_s18 }
   0x6   :  { %s242_s20 = smov 8  }
   0x7   :  { %32 = dma.hbm_to_vmem [thread:$0]  %s25_s16, 2688, %s27_s18, [#allocation5], %s241_s19, %s241_s19, %s242_s20  }
   0x8   :  { %235 = dma.done.wait [#allocation3], 128  }
   0x9   :  { %236 = vsyncadd [#allocation3], 4294967168 }
   0xa   :  { %237 = dma.done.wait [#allocation5], 2688  }
   0xb   :  { %238 = vsyncadd [#allocation5], 4294964608  ;;  %v43_v0 = vld [vmem:[#allocation4 + $0x8] sm:$0xff]  ;;  %v42_v1 = vld [vmem:[#allocation4] sm:$0xff]  ;;  %vm64_vm0 = vcmask 130048   ;;  %v243_v25 = vmov 0  }
   0xc   :  { %82 = vmatpush.msra.mxu0 %v43_v0  ;;  %v41_v2 = vld [vmem:[#allocation2] sm:$0xff]  ;;  %v59_v3 = vld [vmem:[#allocation4 + $0x88] sm:$0xff]  ;;  %v58_v4 = vld [vmem:[#allocation4 + $0x80] sm:$0xff]  ;;  %182 = vset.pattern.permute.xlu0 %v243_v25  ;;  %vm136_vm1 = vcmask 64512  }
   0xd   :  { %90 = vmatpush.msra.mxu1 %v59_v3  ;;  %v57_v5 = vld [vmem:[#allocation4 + $0x78] sm:$0xff]  ;;  %v56_v6 = vld [vmem:[#allocation4 + $0x70] sm:$0xff]  ;;  %v55_v7 = vld [vmem:[#allocation4 + $0x68] sm:$0xff] }
   0xe   :  { %83 = vmatpush.msra.mxu0 %v42_v1  ;;  %v54_v8 = vld [vmem:[#allocation4 + $0x60] sm:$0xff]  ;;  %v53_v9 = vld [vmem:[#allocation4 + $0x58] sm:$0xff]  ;;  %v52_v10 = vld [vmem:[#allocation4 + $0x50] sm:$0xff] }
   0xf   :  { %176 = vmatmul.msk.f32.vlgmr.msra.gmra.mxu0 %vm64_vm0, %v41_v2  ;;  %91 = vmatpush.msra.mxu1 %v58_v4  ;;  %v51_v11 = vld [vmem:[#allocation4 + $0x48] sm:$0xff]  ;;  %v50_v12 = vld [vmem:[#allocation4 + $0x40] sm:$0xff]  ;;  %v49_v13 = vld [vmem:[#allocation4 + $0x38] sm:$0xff] }
  0x10   :  { %v48_v14 = vld [vmem:[#allocation4 + $0x30] sm:$0xff]  ;;  %v47_v15 = vld [vmem:[#allocation4 + $0x28] sm:$0xff]  ;;  %v46_v16 = vld [vmem:[#allocation4 + $0x20] sm:$0xff] }
  0x11   :  { %92 = vmatpush.msra.mxu1 %v57_v5  ;;  %v45_v17 = vld [vmem:[#allocation4 + $0x18] sm:$0xff]  ;;  %v44_v18 = vld [vmem:[#allocation4 + $0x10] sm:$0xff]  ;;  %v62_v19 = vld [vmem:[#allocation4 + $0xa0] sm:$0xff] }
  0x12   :  { %v63_v20 = vperm.slane %v62_v19, 0  ;;  %v61_v24 = vld [vmem:[#allocation4 + $0x98] sm:$0xff]  ;;  %v89_v26 = vperm.slane %v62_v19, 1  ;;  %v60_v30 = vld [vmem:[#allocation4 + $0x90] sm:$0xff] }
  0x13   :  { %93 = vmatpush.msra.mxu1 %v56_v6  ;;  %113 = vperm.xlu0 %182, %v61_v24  }
  0x15   :  { %94 = vmatpush.msra.mxu1 %v55_v7 }
  0x17   :  { %95 = vmatpush.msra.mxu1 %v54_v8 }
  0x19   :  { %96 = vmatpush.msra.mxu1 %v53_v9 }
  0x1b   :  { %97 = vmatpush.msra.mxu1 %v52_v10 }
  0x1d   :  { %98 = vmatpush.msra.mxu1 %v51_v11 }
  0x1f   :  { %99 = vmatpush.msra.mxu1 %v50_v12 }
  0x21   :  { %100 = vmatpush.msra.mxu1 %v49_v13 }
  0x23   :  { %101 = vmatpush.msra.mxu1 %v48_v14 }
  0x25   :  { %102 = vmatpush.msra.mxu1 %v47_v15 }
  0x27   :  { %103 = vmatpush.msra.mxu1 %v46_v16 }
  0x29   :  { %104 = vmatpush.msra.mxu1 %v45_v17 }
  0x2b   :  { %105 = vmatpush.msra.mxu1 %v44_v18 }
  0x85   :  { %v114_v31 = vpop.permute.xlu0 %113 }
  0x8c   :  { %v85_v21 = vpop.f32.mrf.mxu0 }
  0x8d   :  { %v86_v22 = vadd.f32 %v85_v21, %v63_v20 }
  0x8f   :  { %v88_v23 = vmax.f32 %v86_v22, 0.0 }
  0x91   :  { %106 = vmatmul.f32.vlgmr.msra.gmra.mxu1 %v88_v23 }
 0x10e   :  { %v107_v27 = vpop.f32.mrf.mxu1 }
 0x10f   :  { %v108_v28 = vadd.f32 %v107_v27, %v89_v26 }
 0x111   :  { %v110_v29 = vmax.f32 %v108_v28, 0.0 }
 0x113   :  { %131 = vmatpush.xpose.msra.mxu2 %v110_v29 }
 0x116   :  { %132 = vmatmul.f32.vlgmr.msra.gmra.mxu2 %v60_v30 }
 0x199   :  { %v133_v32 = vpop.f32.mrf.mxu2 }
 0x19a   :  { %v134_v33 = vadd.f32 %v133_v32, %v114_v31 }
 0x19c   :  { %v137_v34 = vsel %vm136_vm1, %v134_v33, -inf }
 0x19d   :  { %v138_v35 = vrot.slane %v137_v34, 4 }
 0x19f   :  { %v139_v36 = vmax.f32 %v137_v34, %v138_v35 }
 0x1a1   :  { %v140_v37 = vrot.slane %v139_v36, 2 }
 0x1a3   :  { %v141_v38 = vmax.f32 %v139_v36, %v140_v37 }
 0x1a5   :  { %v142_v39 = vrot.slane %v141_v38, 1 }
 0x1a7   :  { %v143_v40 = vmax.f32 %v141_v38, %v142_v39 }
 0x1a9   :  { %v144_v41 = vsub.f32 %v134_v33, %v143_v40 }
 0x1ab   :  { %v145_v42 = vmul.f32 1.442695, %v144_v41 }
 0x1ad   :  { %183 = vpow2.f32 %v145_v42 }
 0x1b3   :  { %v184_v43 = vpop.eup %183 }
 0x1b4   :  { %v147_v44 = vsel %vm136_vm1, %v184_v43, 0.0 }
 0x1b5   :  { %v148_v45 = vrot.slane %v147_v44, 4 }
 0x1b7   :  { %v149_v46 = vadd.f32 %v148_v45, %v147_v44 }
 0x1b9   :  { %v150_v47 = vrot.slane %v149_v46, 2 }
 0x1bb   :  { %v151_v48 = vadd.f32 %v150_v47, %v149_v46 }
 0x1bd   :  { %v152_v49 = vrot.slane %v151_v48, 1 }
 0x1bf   :  { %v153_v50 = vadd.f32 %v152_v49, %v151_v48 }
 0x1c1   :  { %185 = vrcp.f32 %v153_v50  ;;  %v165_v54 = vand.u32 2147483648, %v153_v50  ;;  %v163_v56 = vand.u32 2147483647, %v153_v50  ;;  %vm159_vm3 = vweird.f32 %v153_v50 }
 0x1c3   :  { %v166_v58 = vor.u32 1.1754944e-38, %v165_v54  ;;  %vm164_vm5 = vcmp.eq.f32.partialorder %v163_v56, 8.507059e+37 }
 0x1c7   :  { %v186_v51 = vpop.eup %185 }
 0x1c8   :  { %v155_v52 = vmul.f32 %v186_v51, %v153_v50  ;;  %vm160_vm2 = vweird.f32 %v186_v51 }
 0x1c9   :  { %vm161_vm4 = vmor %vm159_vm3, %vm160_vm2 }
 0x1ca   :  { %v156_v53 = vsub.f32 1.0, %v155_v52 }
 0x1cc   :  { %v157_v55 = vmul.f32 %v186_v51, %v156_v53 }
 0x1ce   :  { %v158_v57 = vadd.f32 %v186_v51, %v157_v55 }
 0x1d0   :  { %v162_v59 = vsel %vm161_vm4, %v186_v51, %v158_v57 }
 0x1d1   :  { %v167_v60 = vsel %vm164_vm5, %v166_v58, %v162_v59 }
 0x1d2   :  { %v168_v61 = vmul.f32 %v184_v43, %v167_v60 }
 0x1d4   :  { %169 = vst.msk [vmem:[%s273_s2] sm:$0xff] %vm136_vm1, %v168_v61 }
 0x1d5   :  { %174 = vsyncpa [#allocation3], 1 }
 0x1d6   :  { %175 = vsyncpa [#allocation5], 1 }

</bundles_post_ra>
